<compile_context>
chip_gen: v7x
topology: tpu7x:2x2x1
jax: 0.10.0
libtpu: 0.0.40
codegen_flags: <defaults>
</compile_context>

<pallas_src>
import functools

import jax
import jax.numpy as jnp
from jax import lax
from jax.experimental import pallas as pl
from jax.experimental.pallas import tpu as pltpu

_LANES = 128
_MIN_ROW_TILE = 512                       # ~256 KiB f32 block (~85%-roofline point)
_TARGET_BLOCK_BYTES = 8 * 1024 * 1024     # ~8 MiB per block (byte budget, dtype-scaled)
_TARGET_GRID_STEPS = 8                    # desired pipeline depth when splittable
_VMEM_LIMIT_BYTES = 48 * 1024 * 1024      # in+out x double-buffer ~= 4x block bytes

_INV_SQRT2 = 0.7071067811865476           # 1/sqrt(2), hoisted python float

_SUPPORTED = ("tanh", "relu", "gelu", "sigmoid")


@functools.lru_cache(maxsize=None)
def _bf16_compute_native() -> bool:
    """True on TPU generations with native bf16 VPU/EUP (v6e / v7x)."""
    try:
        kind = jax.devices()[0].device_kind.lower()
    except Exception:
        return False
    return not any(f"v{g}" in kind for g in (2, 3, 4, 5))


def _apply_activation(x, activation: str):
    if activation == "tanh":
        return jnp.tanh(x)
    if activation == "relu":
        return jnp.maximum(x, 0.0)
    if activation == "gelu":
        # PyTorch nn.GELU() default is the exact (erf-based) GELU; kept for parity.
        return 0.5 * x * (1.0 + lax.erf(x * _INV_SQRT2))
    # sigmoid
    return jax.nn.sigmoid(x)


def _activation_kernel(x_ref, o_ref, *, activation: str, compute_dtype):
    x = x_ref[...].astype(compute_dtype)
    o_ref[...] = _apply_activation(x, activation).astype(o_ref.dtype)


def _choose_row_tile(rows: int, itemsize: int):
    """Pick (row_tile, grid_steps) from a per-block byte budget."""
    max_rows = max(_MIN_ROW_TILE, _TARGET_BLOCK_BYTES // (_LANES * itemsize))
    if rows < 2 * _MIN_ROW_TILE:
        # Tiny tensor: one full block (exempt from the (8,128) divisibility rule).
        return rows, 1
    tile = pl.cdiv(rows, _TARGET_GRID_STEPS)
    tile = ((tile + 7) // 8) * 8                      # sublane-aligned
    tile = max(_MIN_ROW_TILE, min(tile, max_rows))
    steps = pl.cdiv(rows, tile)
    # Prefer an even step count so v7x can balance the parallel axis over 2 TCs.
    if steps % 2 and steps > 1:
        alt_tile = ((pl.cdiv(rows, steps + 1) + 7) // 8) * 8
        if alt_tile >= _MIN_ROW_TILE:
            alt_steps = pl.cdiv(rows, alt_tile)
            if alt_steps % 2 == 0:
                tile, steps = alt_tile, alt_steps
    return tile, steps


def activation_function(x: jax.Array, activation: str) -> jax.Array:
    """Applies the requested activation element-wise via a Pallas TPU kernel."""
    if activation not in _SUPPORTED:
        raise ValueError("Activation function not supported")

    orig_shape = x.shape
    dtype = x.dtype
    n = x.size
    if n == 0:
        return x

    x_flat = jnp.ravel(x)            # free for contiguous inputs
    n_tail = n % _LANES
    n_main = n - n_tail

    # <=127-element ragged tail: plain jnp (negligible), no full-tensor pad/slice.
    tail_out = None
    if n_tail:
        tail_out = _apply_activation(
            x_flat[n_main:].astype(jnp.float32), activation).astype(dtype)

    if n_main == 0:
        out_flat = tail_out
    else:
        rows = n_main // _LANES
        x2d = x_flat[:n_main].reshape(rows, _LANES)
        row_tile, steps = _choose_row_tile(rows, x.dtype.itemsize)

        # bf16 VPU/EUP is native on v6e/v7x -> compute directly in bf16 there.
        # GELU keeps f32 (erf-polynomial accuracy); v5e always uses f32.
        if dtype == jnp.bfloat16 and activation != "gelu" and _bf16_compute_native():
            compute_dtype = jnp.bfloat16
        else:
            compute_dtype = jnp.float32

        kernel = functools.partial(
            _activation_kernel, activation=activation, compute_dtype=compute_dtype)

        out2d = pl.pallas_call(
            kernel,
            out_shape=jax.ShapeDtypeStruct((rows, _LANES), dtype),
            grid_spec=pltpu.PrefetchScalarGridSpec(
                num_scalar_prefetch=0,
                grid=(steps,),
                in_specs=[pl.BlockSpec((row_tile, _LANES), lambda i: (i, 0))],
                out_specs=pl.BlockSpec((row_tile, _LANES), lambda i: (i, 0)),
            ),
            compiler_params=pltpu.CompilerParams(
                dimension_semantics=("parallel",),   # v7x: shard rows across 2 TCs
                vmem_limit_bytes=_VMEM_LIMIT_BYTES,
            ),
        )(x2d)

        main_flat = out2d.reshape(-1)
        out_flat = main_flat if tail_out is None else jnp.concatenate(
            [main_flat, tail_out])

    return out_flat.reshape(orig_shape)


def _reference(x, activation):
    return _apply_activation(x.astype(jnp.float32), activation).astype(x.dtype)


if __name__ == "__main__":
    key = jax.random.PRNGKey(0)
    k0, k1, k2 = jax.random.split(key, 3)

    # Small NCHW-style feature map (lane-aligned size -> no-copy fast path).
    x = jax.random.normal(k0, (2, 4, 16, 16), dtype=jnp.float32)
    # Ragged size (not a multiple of 128) -> kernel on prefix + jnp tail path.
    x_ragged = jax.random.normal(k1, (5, 7, 13), dtype=jnp.float32)
    # Medium tensor -> multi-step pipelined grid (rows=6144 -> 8 even steps).
    x_med = jax.random.normal(k2, (2, 768, 512), dtype=jnp.float32)
    # bf16 input -> native-bf16 (v6e/v7x) or f32-compute (v5e) path.
    x_bf16 = x.astype(jnp.bfloat16)

    ok = True
    for act in _SUPPORTED:
        for xi, tol in ((x, 1e-5), (x_ragged, 1e-5), (x_med, 1e-5), (x_bf16, 2e-2)):
            y = jax.block_until_ready(activation_function(xi, act))
            ref = _reference(xi, act)
            if y.shape != xi.shape or y.dtype != xi.dtype:
                ok = False
            if not jnp.allclose(y.astype(jnp.float32), ref.astype(jnp.float32),
                                atol=tol, rtol=tol):
                ok = False

    if ok:
        print("KERNEL_OK")
</pallas_src>

<mosaic_0001>
module attributes {stable_mosaic.version = 11 : i64} {
  func.func @_activation_kernel(%arg0: i32, %arg1: memref<16x128xf32, #tpu.memory_space<vmem>>, %arg2: memref<16x128xf32, #tpu.memory_space<vmem>>) attributes {dimension_semantics = [#tpu.dimension_semantics<parallel>], iteration_bounds = array<i64: 1>, scalar_prefetch = 0 : i64, scratch_operands = 0 : i64, tpu.core_type = #tpu.core_type<tc>, window_params = [{transform_indices = @transform_0, window_bounds = array<i64: 16, 128>}, {transform_indices = @transform_1, window_bounds = array<i64: 16, 128>}]} {
    %c0 = arith.constant 0 : index
    %c0_0 = arith.constant 0 : index
    %0 = vector.load %arg1[%c0, %c0_0] : memref<16x128xf32, #tpu.memory_space<vmem>>, vector<16x128xf32>
    %1 = math.tanh %0 : vector<16x128xf32>
    %c0_1 = arith.constant 0 : index
    %c0_2 = arith.constant 0 : index
    %2 = vector.load %arg2[%c0_1, %c0_2] : memref<16x128xf32, #tpu.memory_space<vmem>>, vector<16x128xf32>
    tpu.vector_store %arg2[%c0_1, %c0_2], %1 {strides = array<i32>} : memref<16x128xf32, #tpu.memory_space<vmem>>, vector<16x128xf32>,
    return
  }
  func.func @transform_0(%arg0: i32) -> (i32, i32) {
    %c0_i32 = arith.constant 0 : i32
    %c0_i32_0 = arith.constant 0 : i32
    return %arg0, %c0_i32 : i32, i32
  }
  func.func @transform_1(%arg0: i32) -> (i32, i32) {
    %c0_i32 = arith.constant 0 : i32
    %c0_i32_0 = arith.constant 0 : i32
    return %arg0, %c0_i32 : i32, i32
  }
}

</mosaic_0001>

<bundles_post_ra>
// kernel: tpu_custom_call.1
= control target key start
LH: loop header
LB: loop body
LE: loop exit
PB: predicated region body
PF: predicated region fallthrough
CT: control target
= control target key end

     0   :  { %6 = vsyncpa [#allocation3], 0  ;;  %s146_s0 = inlined_call_operand.hbm [shape: f32[16,128], index: 0, kind: input, shape index: {}]   ;;  %s147_s1 = inlined_call_operand.hbm [shape: f32[16,128], index: 1, kind: output, shape index: {}]  }
   0x1   :  { %7 = vsyncpa [#allocation4], 0  ;;  %s102_s6 = smov [#allocation2]   ;;  %s54_s10 = scalar_lea.hbm %s146_s0, 256 }
   0x2   :  { %s13_s7 = sshll.u32 %s102_s6, 4  ;;  %p55_p0 = scmp.ne.s32.totalorder %s146_s0, %s54_s10  ;;  %s14_s7 = int_to_ptr.vmem [resolvable:$true] %s13_s7 }
   0x3   :  { %p58_p1 = scmp.lt.u32.totalorder %s54_s10, %s146_s0 }
   0x5   :  { %p60_p2 = pnand %p58_p1, %p55_p0 }
   0x7   :  { %63 = shalt.err (!%p60_p2)
}
   0x8   :  { %s64_s15 = scalar_lea.vmem %s14_s7, 256  ;;  %p69_p4 = scmp.lt.s32.totalorder %s14_s7, %s14_s7 }
   0x9   :  { %p65_p3 = scmp.ne.s32.totalorder %s14_s7, %s64_s15  ;;  %p70_p5 = scmp.lt.s32.totalorder %s64_s15, %s64_s15 }
   0xb   :  { %p71_p6 = por %p70_p5, %p69_p4 }
   0xd   :  { %p72_p7 = pnand %p71_p6, %p65_p3 }
   0xf   :  { %75 = shalt.err (!%p72_p7)
}
  0x10   :  { %s103_s16 = smov 128   ;;  %s104_s17 = smov 8  }
  0x11   :  { %19 = dma.hbm_to_vmem [thread:$0]  %s146_s0, 256, %s14_s7, [#allocation3], %s103_s16, %s103_s16, %s104_s17  }
  0x12   :  { %98 = dma.done.wait [#allocation3], 256  }
  0x13   :  { %99 = vsyncadd [#allocation3], 4294967040  ;;  %v23_v0 = vld [vmem:[#allocation2] sm:$0xff]  ;;  %v24_v1 = vld [vmem:[#allocation2 + $0x8] sm:$0xff]  ;;  %s105_s20 = smov [#allocation5]  }
  0x14   :  { %50 = vtanh.f32 %v23_v0  ;;  %s34_s21 = sshll.u32 %s105_s20, 4  ;;  %s35_s21 = int_to_ptr.vmem [resolvable:$true] %s34_s21 }
  0x15   :  { %52 = vtanh.f32 %v24_v1  ;;  %s76_s22 = scalar_lea.vmem %s35_s21, 256  ;;  %p81_p9 = scmp.lt.s32.totalorder %s35_s21, %s35_s21 }
  0x16   :  { %p77_p8 = scmp.ne.s32.totalorder %s35_s21, %s76_s22  ;;  %p82_p10 = scmp.lt.s32.totalorder %s76_s22, %s76_s22 }
  0x18   :  { %p83_p11 = por %p82_p10, %p81_p9 }
  0x1a   :  { %p84_p12 = pnand %p83_p11, %p77_p8 }
  0x1e   :  { %v51_v2 = vpop.eup %50 }
  0x1f   :  { %v53_v3 = vpop.eup %52  ;;  %27 = vst [vmem:[#allocation5] sm:$0xff] %v51_v2 }
  0x20   :  { %28 = vst [vmem:[#allocation5 + $0x8] sm:$0xff] %v53_v3 }
  0x21   :  { %87 = shalt.err (!%p84_p12)
}
  0x22   :  { %s88_s24 = scalar_lea.hbm %s147_s1, 256 }
  0x23   :  { %p89_p13 = scmp.ne.s32.totalorder %s147_s1, %s88_s24  ;;  %p92_p0 = scmp.lt.u32.totalorder %s88_s24, %s147_s1 }
  0x25   :  { %p94_p1 = pnand %p92_p0, %p89_p13 }
  0x27   :  { %97 = shalt.err (!%p94_p1)
}
  0x28   :  { %40 = dma.vmem_to_hbm [thread:$0]  %s35_s21, 256, %s147_s1, [#allocation4], %s103_s16, %s103_s16, %s104_s17  }
  0x29   :  { %100 = dma.done.wait [#allocation4], 256  }
  0x2a   :  { %101 = vsyncadd [#allocation4], 4294967040 }
  0x2b   :  { %44 = vsyncpa [#allocation3], 1 }
  0x2c   :  { %45 = vsyncpa [#allocation4], 1 }

</bundles_post_ra>
